<compile_context>
chip_gen: v6e
topology: v6e:2x2x1
jax: 0.10.0
libtpu: 0.0.40
codegen_flags: <defaults>
</compile_context>

<pallas_src>
import functools

import jax
import jax.numpy as jnp
from jax.experimental import pallas as pl
from jax.experimental.pallas import tpu as pltpu

LAMBDA_CLASS = 1.0
LAMBDA_NOOBJ = 10.0
LAMBDA_OBJ = 1.0
LAMBDA_BOX = 10.0


def _round_up(x, m):
    return ((x + m - 1) // m) * m


def _cdiv(a, b):
    return -(-a // b)


def _yolo_loss_kernel(hobj_ref, clsblk_ref, anc_ref, pbox_ref, pcls_ref, tgt_ref,
                      out_ref, *, num_classes, sub_slabs, tiles_per_half):
    """
    hobj_ref  : (A, 2*T) SMEM int32  -- 1 iff that (anchor, tile) has object cells
    clsblk_ref: (A, 2*T) SMEM int32  -- class-logit block table (used in index_map)
    anc_ref   : (A, 4)   SMEM f32    -- [anc_w, anc_h, 1/anc_w, 1/anc_h]
    pbox_ref  : (5, TS, 128)  VMEM   -- [obj, x, y, w, h] logits, channel-major
    pcls_ref  : (NC, TS, 128) VMEM   -- class logits (DMA elided on obj-free tiles)
    tgt_ref   : (6, TS, 128)  VMEM   -- [obj, x, y, w, h, class]
    out_ref   : (6, 8, 128)   VMEM   -- per-(split, anchor) accumulators, resident
                across the tile axis:
                [noobj_bce, noobj_cnt, obj_bce, obj_cnt, box_sq, class_ce]
    """
    s = pl.program_id(0)
    a = pl.program_id(1)
    t = pl.program_id(2)
    tile_idx = s * tiles_per_half + t

    @pl.when(t == 0)
    def _init():
        out_ref[...] = jnp.zeros_like(out_ref)

    anc_w = anc_ref[a, 0]
    anc_h = anc_ref[a, 1]
    inv_anc_w = anc_ref[a, 2]
    inv_anc_h = anc_ref[a, 3]

    # ---- always-on pass: no-object BCE + obj / noobj counts (cheap) --------
    for j in range(sub_slabs):
        sl = slice(8 * j, 8 * (j + 1))
        p0 = pbox_ref[0, sl, :].astype(jnp.float32)
        t0 = tgt_ref[0, sl, :].astype(jnp.float32)
        obj = t0 == 1.0
        noobj = t0 == 0.0
        zeros = jnp.zeros_like(t0)
        ones = jnp.ones_like(t0)
        # BCEWithLogits(x, 0) == softplus(x)
        sp = jnp.maximum(p0, 0.0) + jnp.log(1.0 + jnp.exp(-jnp.abs(p0)))
        out_ref[0] = out_ref[0] + jnp.where(noobj, sp, zeros)
        out_ref[1] = out_ref[1] + jnp.where(noobj, ones, zeros)
        out_ref[3] = out_ref[3] + jnp.where(obj, ones, zeros)

    # ---- sparse pass: decode / IoU / obj BCE / box MSE / class CE ----------
    @pl.when(hobj_ref[a, tile_idx] > 0)
    def _obj_pass():
        for j in range(sub_slabs):
            sl = slice(8 * j, 8 * (j + 1))
            pb = pbox_ref[:, sl, :].astype(jnp.float32)   # (5, 8, 128)
            tg = tgt_ref[:, sl, :].astype(jnp.float32)    # (6, 8, 128)
            p0 = pb[0]
            t0 = tg[0]
            obj = t0 == 1.0
            zeros = jnp.zeros_like(t0)

            sp = jnp.maximum(p0, 0.0) + jnp.log(1.0 + jnp.exp(-jnp.abs(p0)))
            sx = jax.nn.sigmoid(pb[1])
            sy = jax.nn.sigmoid(pb[2])
            bw = jnp.exp(pb[3]) * anc_w
            bh = jnp.exp(pb[4]) * anc_h
            tx, ty, tw, th = tg[1], tg[2], tg[3], tg[4]

            iw = jnp.maximum(jnp.minimum(sx + 0.5 * bw, tx + 0.5 * tw)
                             - jnp.maximum(sx - 0.5 * bw, tx - 0.5 * tw), 0.0)
            ih = jnp.maximum(jnp.minimum(sy + 0.5 * bh, ty + 0.5 * th)
                             - jnp.maximum(sy - 0.5 * bh, ty - 0.5 * th), 0.0)
            inter = iw * ih
            union = jnp.abs(bw * bh) + jnp.abs(tw * th) - inter + 1e-6
            iou = inter / union                 # exact divide: IoU is a BCE target

            # BCEWithLogits(p0, iou) on object cells (target obj flag == 1).
            out_ref[2] = out_ref[2] + jnp.where(obj, sp - p0 * iou, zeros)

            dx = sx - tx
            dy = sy - ty
            dw = pb[3] - jnp.log(tw * inv_anc_w + 1e-16)
            dh = pb[4] - jnp.log(th * inv_anc_h + 1e-16)
            out_ref[4] = out_ref[4] + jnp.where(
                obj, dx * dx + dy * dy + dw * dw + dh * dh, zeros)

            # class cross-entropy: two passes over the small static class count
            # so only one class channel is live at a time (register friendly).
            labels = tg[5]
            mmax = pcls_ref[0, sl, :].astype(jnp.float32)
            for c in range(1, num_classes):
                mmax = jnp.maximum(mmax, pcls_ref[c, sl, :].astype(jnp.float32))
            ssum = zeros
            picked = zeros
            for c in range(num_classes):
                lc = pcls_ref[c, sl, :].astype(jnp.float32)
                ssum = ssum + jnp.exp(lc - mmax)
                picked = picked + jnp.where(labels == float(c), lc, zeros)
            lse = mmax + jnp.log(ssum)
            out_ref[5] = out_ref[5] + jnp.where(obj, lse - picked, zeros)


def yolo_loss(predictions, target, anchors, *, tile_cells=8192):
    """predictions: (N, 3, S, S, 5+NC), target: (N, 3, S, S, 6), anchors: (3, 2)."""
    N, A, S1, S2, C = predictions.shape
    num_classes = C - 5
    assert num_classes >= 1
    M = N * S1 * S2                               # cells per anchor

    # channel-major / anchor-major layout: (A, C, cells), cells lane-dense.
    # TODO(synk): ideally the ScalePrediction head emits this layout directly;
    # here the wrapper pays one layout-transform pass over pred/target.
    pred_cm = jnp.transpose(predictions, (1, 4, 0, 2, 3)).reshape(A, C, M)
    tgt_cm = jnp.transpose(target, (1, 4, 0, 2, 3)).reshape(A, 6, M)

    # Tile selection: start from tile_cells, then shrink the tile so the 2-way
    # (megacore) split pads by as little as possible while staying a multiple
    # of 1024 cells (-> ts multiple of 8 sublanes).
    tile0 = min(_round_up(tile_cells, 1024), _round_up(M, 1024))
    num_tiles0 = _cdiv(M, tile0)
    half_tiles = _cdiv(num_tiles0, 2)             # tiles per split half
    total_tiles = 2 * half_tiles
    tile = _round_up(_cdiv(M, total_tiles), 1024)
    ts = tile // 128
    sub_slabs = ts // 8
    Mp = total_tiles * tile

    if Mp != M:
        pad = Mp - M
        pred_cm = jnp.pad(pred_cm, ((0, 0), (0, 0), (0, pad)))
        # padded cells get obj flag -1 -> excluded from every mask and count.
        pad_row = jnp.array([-1.0, 0.5, 0.5, 1.0, 1.0, 0.0], jnp.float32)
        pad_tgt = jnp.broadcast_to(pad_row[None, :, None], (A, 6, pad)).astype(tgt_cm.dtype)
        tgt_cm = jnp.concatenate([tgt_cm, pad_tgt], axis=2)

    rows = Mp // 128
    pbox = pred_cm[:, :5, :].reshape(A, 5, rows, 128)
    pcls = pred_cm[:, 5:, :].reshape(A, num_classes, rows, 128)
    tgt4 = tgt_cm.reshape(A, 6, rows, 128)

    anc = anchors.reshape(A, 2).astype(jnp.float32)
    anc_tbl = jnp.concatenate([anc, 1.0 / anc], axis=1)           # (A, 4) -> SMEM

    # per-(anchor, tile) has-object table; class-logit block table repeats the
    # last object-carrying tile index so object-free tiles elide the class DMA.
    obj_flag = (tgt_cm[:, 0, :] == 1.0).reshape(A, total_tiles, tile)
    has_obj = jnp.any(obj_flag, axis=2).astype(jnp.int32)         # (A, total_tiles)
    gids = jnp.arange(total_tiles, dtype=jnp.int32).reshape(1, 2, half_tiles)
    cand = jnp.where(has_obj.reshape(A, 2, half_tiles) > 0, gids, -1)
    last = jax.lax.cummax(cand, axis=2)
    cls_blk = jnp.where(last >= 0, last, 0).reshape(A, total_tiles).astype(jnp.int32)

    T2 = half_tiles
    in_itemsize = predictions.dtype.itemsize
    block_bytes = (5 + num_classes + 6) * ts * 128 * in_itemsize
    # double-buffered in/out blocks + slack; capped for v7x's 64 MiB VMEM.
    vmem_limit = int(min(48 * 2**20, max(8 * 2**20, 4 * block_bytes + 4 * 2**20)))

    cost = pl.CostEstimate(
        flops=int(A * Mp * (40 + 5 * num_classes)),
        transcendentals=int(A * Mp * (6 + num_classes)),
        bytes_accessed=int((pbox.size + pcls.size + tgt4.size) * in_itemsize
                           + 2 * A * 6 * 8 * 128 * 4),
    )

    out = pl.pallas_call(
        functools.partial(_yolo_loss_kernel, num_classes=num_classes,
                          sub_slabs=sub_slabs, tiles_per_half=T2),
        out_shape=jax.ShapeDtypeStruct((2, A, 6, 8, 128), jnp.float32),
        grid_spec=pltpu.PrefetchScalarGridSpec(
            num_scalar_prefetch=2,
            grid=(2, A, T2),
            in_specs=[
                pl.BlockSpec(memory_space=pltpu.MemorySpace.SMEM),             # anchors
                pl.BlockSpec((None, 5, ts, 128),
                             lambda s, a, t, ho, cb: (a, 0, s * T2 + t, 0)),   # box/obj
                pl.BlockSpec((None, num_classes, ts, 128),
                             lambda s, a, t, ho, cb: (a, 0, cb[a, s * T2 + t], 0)),  # cls
                pl.BlockSpec((None, 6, ts, 128),
                             lambda s, a, t, ho, cb: (a, 0, s * T2 + t, 0)),   # target
            ],
            out_specs=pl.BlockSpec((None, None, 6, 8, 128),
                                   lambda s, a, t, ho, cb: (s, a, 0, 0, 0)),
        ),
        compiler_params=pltpu.CompilerParams(
            dimension_semantics=("parallel", "parallel", "arbitrary"),
            vmem_limit_bytes=vmem_limit,
        ),
        cost_estimate=cost,
    )(has_obj, cls_blk, anc_tbl, pbox, pcls, tgt4)

    totals = jnp.sum(out, axis=(0, 1, 3, 4))                      # (6,) global sums
    noobj_sum, noobj_cnt = totals[0], totals[1]
    obj_sum, obj_cnt = totals[2], totals[3]
    box_sq_sum, ce_sum = totals[4], totals[5]

    obj_n = jnp.maximum(obj_cnt, 1.0)                             # guard empty masks
    noobj_n = jnp.maximum(noobj_cnt, 1.0)

    no_object_loss = noobj_sum / noobj_n          # mean over noobj cells
    object_loss = obj_sum / obj_n                 # mean over obj cells
    box_loss = box_sq_sum / (4.0 * obj_n)         # MSE mean over (n_obj, 4) elements
    class_loss = ce_sum / obj_n                   # CE mean over obj cells

    return (LAMBDA_BOX * box_loss + LAMBDA_OBJ * object_loss +
            LAMBDA_NOOBJ * no_object_loss + LAMBDA_CLASS * class_loss)


def yolo_loss_ref(predictions, target, anchors):
    """Pure-JAX reference (same semantics), for verification."""
    pred = predictions.astype(jnp.float32)
    tgt = target.astype(jnp.float32)
    anc = anchors.reshape(1, 3, 1, 1, 2).astype(jnp.float32)

    obj = tgt[..., 0] == 1.0
    noobj = tgt[..., 0] == 0.0

    def bce(x, y):
        return jnp.maximum(x, 0.0) - x * y + jnp.log(1.0 + jnp.exp(-jnp.abs(x)))

    no_object_loss = jnp.sum(jnp.where(noobj, bce(pred[..., 0], tgt[..., 0]), 0.0)) / jnp.sum(noobj)

    sx = jax.nn.sigmoid(pred[..., 1])
    sy = jax.nn.sigmoid(pred[..., 2])
    bw = jnp.exp(pred[..., 3]) * anc[..., 0]
    bh = jnp.exp(pred[..., 4]) * anc[..., 1]
    tx, ty, tw, th = tgt[..., 1], tgt[..., 2], tgt[..., 3], tgt[..., 4]

    inter = (jnp.maximum(jnp.minimum(sx + bw / 2, tx + tw / 2) - jnp.maximum(sx - bw / 2, tx - tw / 2), 0.0) *
             jnp.maximum(jnp.minimum(sy + bh / 2, ty + th / 2) - jnp.maximum(sy - bh / 2, ty - th / 2), 0.0))
    union = jnp.abs(bw * bh) + jnp.abs(tw * th) - inter + 1e-6
    iou = inter / union

    n_obj = jnp.sum(obj)
    object_loss = jnp.sum(jnp.where(obj, bce(pred[..., 0], iou * tgt[..., 0]), 0.0)) / n_obj

    dw = pred[..., 3] - jnp.log(tw / anc[..., 0] + 1e-16)
    dh = pred[..., 4] - jnp.log(th / anc[..., 1] + 1e-16)
    dx = sx - tx
    dy = sy - ty
    box_loss = jnp.sum(jnp.where(obj, dx * dx + dy * dy + dw * dw + dh * dh, 0.0)) / (4.0 * n_obj)

    logits = pred[..., 5:]
    labels = tgt[..., 5].astype(jnp.int32)
    lse = jax.nn.logsumexp(logits, axis=-1)
    picked = jnp.take_along_axis(logits, labels[..., None], axis=-1)[..., 0]
    class_loss = jnp.sum(jnp.where(obj, lse - picked, 0.0)) / n_obj

    return (LAMBDA_BOX * box_loss + LAMBDA_OBJ * object_loss +
            LAMBDA_NOOBJ * no_object_loss + LAMBDA_CLASS * class_loss)


if __name__ == "__main__":
    key = jax.random.PRNGKey(0)
    N, A, S, NC = 2, 3, 8, 4
    C = 5 + NC
    k1, k2, k3, k4, k5 = jax.random.split(key, 5)

    predictions = jax.random.normal(k1, (N, A, S, S, C), jnp.float32)

    obj_flag = jax.random.bernoulli(k2, 0.3, (N, A, S, S)).astype(jnp.float32)
    # make sure both obj and noobj cells exist
    obj_flag = obj_flag.at[0, 0, 0, 0].set(1.0).at[0, 0, 0, 1].set(0.0)
    xy = jax.random.uniform(k3, (N, A, S, S, 2), minval=0.05, maxval=0.95)
    wh = jax.random.uniform(k4, (N, A, S, S, 2), minval=0.1, maxval=2.0)
    cls = jax.random.randint(k5, (N, A, S, S, 1), 0, NC).astype(jnp.float32)
    target = jnp.concatenate([obj_flag[..., None], xy, wh, cls], axis=-1)

    anchors = jnp.array([[0.28, 0.22], [0.38, 0.48], [0.90, 0.78]], jnp.float32)

    loss = jax.block_until_ready(jax.jit(yolo_loss)(predictions, target, anchors))
    ref = jax.block_until_ready(yolo_loss_ref(predictions, target, anchors))

    assert jnp.isfinite(loss), "kernel produced non-finite loss"
    assert abs(float(loss) - float(ref)) <= 2e-3 * max(1.0, abs(float(ref))), (
        f"mismatch: kernel={float(loss)} ref={float(ref)}")
    print("KERNEL_OK")
</pallas_src>

<mosaic_0001>
module attributes {stable_mosaic.version = 11 : i64} {
  func.func @_yolo_loss_kernel(%arg0: i32, %arg1: i32, %arg2: i32, %arg3: memref<3x2xi32, #tpu.memory_space<smem>>, %arg4: memref<3x2xi32, #tpu.memory_space<smem>>, %arg5: memref<3x4xf32, #tpu.memory_space<smem>>, %arg6: memref<1x5x8x128xf32, #tpu.memory_space<vmem>>, %arg7: memref<1x4x8x128xf32, #tpu.memory_space<vmem>>, %arg8: memref<1x6x8x128xf32, #tpu.memory_space<vmem>>, %arg9: memref<1x1x6x8x128xf32, #tpu.memory_space<vmem>>) attributes {dimension_semantics = [#tpu.dimension_semantics<parallel>, #tpu.dimension_semantics<parallel>, #tpu.dimension_semantics<arbitrary>], iteration_bounds = array<i64: 2, 3, 1>, scalar_prefetch = 2 : i64, scratch_operands = 0 : i64, tpu.core_type = #tpu.core_type<tc>, window_params = [{transform_indices = @transform_0, window_bounds = array<i64: 3, 4>}, {transform_indices = @transform_1, window_bounds = array<i64: 1, 5, 8, 128>}, {transform_indices = @transform_2, window_bounds = array<i64: 1, 4, 8, 128>}, {transform_indices = @transform_3, window_bounds = array<i64: 1, 6, 8, 128>}, {transform_indices = @transform_4, window_bounds = array<i64: 1, 1, 6, 8, 128>}]} {
    %c1_i32 = arith.constant 1 : i32
    %0 = arith.muli %arg0, %c1_i32 : i32
    %1 = arith.addi %0, %arg2 : i32
    %c0_i32 = arith.constant 0 : i32
    %2 = arith.cmpi eq, %arg2, %c0_i32 : i32
    %3 = arith.extui %2 : i1 to i32
    %c0_i32_0 = arith.constant 0 : i32
    %4 = arith.cmpi ne, %3, %c0_i32_0 : i32
    scf.if %4 {
      %cst_47 = arith.constant 0.000000e+00 : f32
      %60 = vector.broadcast %cst_47 : f32 to vector<6x8x128xf32>
      %c0_48 = arith.constant 0 : index
      %c0_49 = arith.constant 0 : index
      %c0_50 = arith.constant 0 : index
      %c0_51 = arith.constant 0 : index
      %c0_52 = arith.constant 0 : index
      %61 = vector.load %arg9[%c0_48, %c0_49, %c0_50, %c0_51, %c0_52] : memref<1x1x6x8x128xf32, #tpu.memory_space<vmem>>, vector<1x1x6x8x128xf32>
      %62 = vector.shape_cast %61 : vector<1x1x6x8x128xf32> to vector<6x8x128xf32>
      %63 = vector.shape_cast %60 : vector<6x8x128xf32> to vector<1x1x6x8x128xf32>
      tpu.vector_store %arg9[%c0_48, %c0_49, %c0_50, %c0_51, %c0_52], %63 {strides = array<i32>} : memref<1x1x6x8x128xf32, #tpu.memory_space<vmem>>, vector<1x1x6x8x128xf32>,
    } else {
    }
    %5 = arith.index_cast %arg1 : i32 to index
    %c0 = arith.constant 0 : index
    %6 = memref.load %arg5[%5, %c0] : memref<3x4xf32, #tpu.memory_space<smem>>
    %7 = arith.index_cast %arg1 : i32 to index
    %c1 = arith.constant 1 : index
    %8 = memref.load %arg5[%7, %c1] : memref<3x4xf32, #tpu.memory_space<smem>>
    %9 = arith.index_cast %arg1 : i32 to index
    %c2 = arith.constant 2 : index
    %10 = memref.load %arg5[%9, %c2] : memref<3x4xf32, #tpu.memory_space<smem>>
    %11 = arith.index_cast %arg1 : i32 to index
    %c3 = arith.constant 3 : index
    %12 = memref.load %arg5[%11, %c3] : memref<3x4xf32, #tpu.memory_space<smem>>
    %c0_1 = arith.constant 0 : index
    %c0_2 = arith.constant 0 : index
    %c0_3 = arith.constant 0 : index
    %c0_4 = arith.constant 0 : index
    %13 = vector.load %arg6[%c0_1, %c0_2, %c0_3, %c0_4] : memref<1x5x8x128xf32, #tpu.memory_space<vmem>>, vector<1x1x8x128xf32>
    %14 = vector.shape_cast %13 : vector<1x1x8x128xf32> to vector<8x128xf32>
    %c0_5 = arith.constant 0 : index
    %c0_6 = arith.constant 0 : index
    %c0_7 = arith.constant 0 : index
    %c0_8 = arith.constant 0 : index
    %15 = vector.load %arg8[%c0_5, %c0_6, %c0_7, %c0_8] : memref<1x6x8x128xf32, #tpu.memory_space<vmem>>, vector<1x1x8x128xf32>
    %16 = vector.shape_cast %15 : vector<1x1x8x128xf32> to vector<8x128xf32>
    %cst = arith.constant 1.000000e+00 : f32
    %17 = vector.broadcast %cst : f32 to vector<8x128xf32>
    %18 = arith.cmpf oeq, %16, %17 : vector<8x128xf32>
    %cst_9 = arith.constant 0.000000e+00 : f32
    %19 = vector.broadcast %cst_9 : f32 to vector<8x128xf32>
    %20 = arith.cmpf oeq, %16, %19 : vector<8x128xf32>
    %cst_10 = arith.constant 0.000000e+00 : f32
    %21 = vector.broadcast %cst_10 : f32 to vector<8x128xf32>
    %cst_11 = arith.constant 1.000000e+00 : f32
    %22 = vector.broadcast %cst_11 : f32 to vector<8x128xf32>
    %cst_12 = arith.constant 0.000000e+00 : f32
    %23 = vector.broadcast %cst_12 : f32 to vector<8x128xf32>
    %24 = arith.maximumf %14, %23 : vector<8x128xf32>
    %25 = math.absf %14 : vector<8x128xf32>
    %cst_13 = arith.constant 0.000000e+00 : f32
    %26 = vector.broadcast %cst_13 : f32 to vector<8x128xf32>
    %27 = arith.subf %26, %25 : vector<8x128xf32>
    %28 = math.exp %27 : vector<8x128xf32>
    %cst_14 = arith.constant 1.000000e+00 : f32
    %29 = vector.broadcast %cst_14 : f32 to vector<8x128xf32>
    %30 = arith.addf %29, %28 : vector<8x128xf32>
    %31 = math.log %30 : vector<8x128xf32>
    %32 = arith.addf %24, %31 : vector<8x128xf32>
    %c0_15 = arith.constant 0 : index
    %c0_16 = arith.constant 0 : index
    %c0_17 = arith.constant 0 : index
    %c0_18 = arith.constant 0 : index
    %c0_19 = arith.constant 0 : index
    %33 = vector.load %arg9[%c0_15, %c0_16, %c0_17, %c0_18, %c0_19] : memref<1x1x6x8x128xf32, #tpu.memory_space<vmem>>, vector<1x1x1x8x128xf32>
    %34 = vector.shape_cast %33 : vector<1x1x1x8x128xf32> to vector<8x128xf32>
    %35 = arith.select %20, %32, %21 : vector<8x128xi1>, vector<8x128xf32>
    %36 = arith.addf %34, %35 : vector<8x128xf32>
    %c0_20 = arith.constant 0 : index
    %c0_21 = arith.constant 0 : index
    %c0_22 = arith.constant 0 : index
    %c0_23 = arith.constant 0 : index
    %c0_24 = arith.constant 0 : index
    %37 = vector.load %arg9[%c0_20, %c0_21, %c0_22, %c0_23, %c0_24] : memref<1x1x6x8x128xf32, #tpu.memory_space<vmem>>, vector<1x1x1x8x128xf32>
    %38 = vector.shape_cast %37 : vector<1x1x1x8x128xf32> to vector<8x128xf32>
    %39 = vector.shape_cast %36 : vector<8x128xf32> to vector<1x1x1x8x128xf32>
    tpu.vector_store %arg9[%c0_20, %c0_21, %c0_22, %c0_23, %c0_24], %39 {strides = array<i32>} : memref<1x1x6x8x128xf32, #tpu.memory_space<vmem>>, vector<1x1x1x8x128xf32>,
    %c0_25 = arith.constant 0 : index
    %c0_26 = arith.constant 0 : index
    %c1_27 = arith.constant 1 : index
    %c0_28 = arith.constant 0 : index
    %c0_29 = arith.constant 0 : index
    %40 = vector.load %arg9[%c0_25, %c0_26, %c1_27, %c0_28, %c0_29] : memref<1x1x6x8x128xf32, #tpu.memory_space<vmem>>, vector<1x1x1x8x128xf32>
    %41 = vector.shape_cast %40 : vector<1x1x1x8x128xf32> to vector<8x128xf32>
    %42 = arith.select %20, %22, %21 : vector<8x128xi1>, vector<8x128xf32>
    %43 = arith.addf %41, %42 : vector<8x128xf32>
    %c0_30 = arith.constant 0 : index
    %c0_31 = arith.constant 0 : index
    %c1_32 = arith.constant 1 : index
    %c0_33 = arith.constant 0 : index
    %c0_34 = arith.constant 0 : index
    %44 = vector.load %arg9[%c0_30, %c0_31, %c1_32, %c0_33, %c0_34] : memref<1x1x6x8x128xf32, #tpu.memory_space<vmem>>, vector<1x1x1x8x128xf32>
    %45 = vector.shape_cast %44 : vector<1x1x1x8x128xf32> to vector<8x128xf32>
    %46 = vector.shape_cast %43 : vector<8x128xf32> to vector<1x1x1x8x128xf32>
    tpu.vector_store %arg9[%c0_30, %c0_31, %c1_32, %c0_33, %c0_34], %46 {strides = array<i32>} : memref<1x1x6x8x128xf32, #tpu.memory_space<vmem>>, vector<1x1x1x8x128xf32>,
    %c0_35 = arith.constant 0 : index
    %c0_36 = arith.constant 0 : index
    %c3_37 = arith.constant 3 : index
    %c0_38 = arith.constant 0 : index
    %c0_39 = arith.constant 0 : index
    %47 = vector.load %arg9[%c0_35, %c0_36, %c3_37, %c0_38, %c0_39] : memref<1x1x6x8x128xf32, #tpu.memory_space<vmem>>, vector<1x1x1x8x128xf32>
    %48 = vector.shape_cast %47 : vector<1x1x1x8x128xf32> to vector<8x128xf32>
    %49 = arith.select %18, %22, %21 : vector<8x128xi1>, vector<8x128xf32>
    %50 = arith.addf %48, %49 : vector<8x128xf32>
    %c0_40 = arith.constant 0 : index
    %c0_41 = arith.constant 0 : index
    %c3_42 = arith.constant 3 : index
    %c0_43 = arith.constant 0 : index
    %c0_44 = arith.constant 0 : index
    %51 = vector.load %arg9[%c0_40, %c0_41, %c3_42, %c0_43, %c0_44] : memref<1x1x6x8x128xf32, #tpu.memory_space<vmem>>, vector<1x1x1x8x128xf32>
    %52 = vector.shape_cast %51 : vector<1x1x1x8x128xf32> to vector<8x128xf32>
    %53 = vector.shape_cast %50 : vector<8x128xf32> to vector<1x1x1x8x128xf32>
    tpu.vector_store %arg9[%c0_40, %c0_41, %c3_42, %c0_43, %c0_44], %53 {strides = array<i32>} : memref<1x1x6x8x128xf32, #tpu.memory_space<vmem>>, vector<1x1x1x8x128xf32>,
    %54 = arith.index_cast %arg1 : i32 to index
    %55 = arith.index_cast %1 : i32 to index
    %56 = memref.load %arg3[%54, %55] : memref<3x2xi32, #tpu.memory_space<smem>>
    %c0_i32_45 = arith.constant 0 : i32
    %57 = arith.cmpi sgt, %56, %c0_i32_45 : i32
    %58 = arith.extui %57 : i1 to i32
    %c0_i32_46 = arith.constant 0 : i32
    %59 = arith.cmpi ne, %58, %c0_i32_46 : i32
    scf.if %59 {
      %c0_47 = arith.constant 0 : index
      %c0_48 = arith.constant 0 : index
      %c0_49 = arith.constant 0 : index
      %c0_50 = arith.constant 0 : index
      %60 = vector.load %arg6[%c0_47, %c0_48, %c0_49, %c0_50] : memref<1x5x8x128xf32, #tpu.memory_space<vmem>>, vector<1x5x8x128xf32>
      %61 = vector.shape_cast %60 : vector<1x5x8x128xf32> to vector<5x8x128xf32>
      %c0_51 = arith.constant 0 : index
      %c0_52 = arith.constant 0 : index
      %c0_53 = arith.constant 0 : index
      %c0_54 = arith.constant 0 : index
      %62 = vector.load %arg8[%c0_51, %c0_52, %c0_53, %c0_54] : memref<1x6x8x128xf32, #tpu.memory_space<vmem>>, vector<1x6x8x128xf32>
      %63 = vector.shape_cast %62 : vector<1x6x8x128xf32> to vector<6x8x128xf32>
      %64 = vector.extract_strided_slice %61 {offsets = [0, 0, 0], sizes = [1, 8, 128], strides = [1, 1, 1]} : vector<5x8x128xf32> to vector<1x8x128xf32>
      %65 = vector.shape_cast %64 : vector<1x8x128xf32> to vector<8x128xf32>
      %66 = vector.extract_strided_slice %63 {offsets = [0, 0, 0], sizes = [1, 8, 128], strides = [1, 1, 1]} : vector<6x8x128xf32> to vector<1x8x128xf32>
      %67 = vector.shape_cast %66 : vector<1x8x128xf32> to vector<8x128xf32>
      %cst_55 = arith.constant 1.000000e+00 : f32
      %68 = vector.broadcast %cst_55 : f32 to vector<8x128xf32>
      %69 = arith.cmpf oeq, %67, %68 : vector<8x128xf32>
      %cst_56 = arith.constant 0.000000e+00 : f32
      %70 = vector.broadcast %cst_56 : f32 to vector<8x128xf32>
      %cst_57 = arith.constant 0.000000e+00 : f32
      %71 = vector.broadcast %cst_57 : f32 to vector<8x128xf32>
      %72 = arith.maximumf %65, %71 : vector<8x128xf32>
      %73 = math.absf %65 : vector<8x128xf32>
      %cst_58 = arith.constant 0.000000e+00 : f32
      %74 = vector.broadcast %cst_58 : f32 to vector<8x128xf32>
      %75 = arith.subf %74, %73 : vector<8x128xf32>
      %76 = math.exp %75 : vector<8x128xf32>
      %cst_59 = arith.constant 1.000000e+00 : f32
      %77 = vector.broadcast %cst_59 : f32 to vector<8x128xf32>
      %78 = arith.addf %77, %76 : vector<8x128xf32>
      %79 = math.log %78 : vector<8x128xf32>
      %80 = arith.addf %72, %79 : vector<8x128xf32>
      %81 = vector.extract_strided_slice %61 {offsets = [1, 0, 0], sizes = [1, 8, 128], strides = [1, 1, 1]} : vector<5x8x128xf32> to vector<1x8x128xf32>
      %82 = vector.shape_cast %81 : vector<1x8x128xf32> to vector<8x128xf32>
      %83 = arith.negf %82 : vector<8x128xf32>
      %84 = math.exp %83 : vector<8x128xf32>
      %cst_60 = arith.constant 1.000000e+00 : f32
      %85 = vector.broadcast %cst_60 : f32 to vector<8x128xf32>
      %86 = arith.addf %85, %84 : vector<8x128xf32>
      %87 = arith.divf %85, %86 : vector<8x128xf32>
      %88 = vector.extract_strided_slice %61 {offsets = [2, 0, 0], sizes = [1, 8, 128], strides = [1, 1, 1]} : vector<5x8x128xf32> to vector<1x8x128xf32>
      %89 = vector.shape_cast %88 : vector<1x8x128xf32> to vector<8x128xf32>
      %90 = arith.negf %89 : vector<8x128xf32>
      %91 = math.exp %90 : vector<8x128xf32>
      %cst_61 = arith.constant 1.000000e+00 : f32
      %92 = vector.broadcast %cst_61 : f32 to vector<8x128xf32>
      %93 = arith.addf %92, %91 : vector<8x128xf32>
      %94 = arith.divf %92, %93 : vector<8x128xf32>
      %95 = vector.extract_strided_slice %61 {offsets = [3, 0, 0], sizes = [1, 8, 128], strides = [1, 1, 1]} : vector<5x8x128xf32> to vector<1x8x128xf32>
      %96 = vector.shape_cast %95 : vector<1x8x128xf32> to vector<8x128xf32>
      %97 = math.exp %96 : vector<8x128xf32>
      %98 = vector.broadcast %6 : f32 to vector<8x128xf32>
      %99 = arith.mulf %97, %98 : vector<8x128xf32>
      %100 = vector.extract_strided_slice %61 {offsets = [4, 0, 0], sizes = [1, 8, 128], strides = [1, 1, 1]} : vector<5x8x128xf32> to vector<1x8x128xf32>
      %101 = vector.shape_cast %100 : vector<1x8x128xf32> to vector<8x128xf32>
      %102 = math.exp %101 : vector<8x128xf32>
      %103 = vector.broadcast %8 : f32 to vector<8x128xf32>
      %104 = arith.mulf %102, %103 : vector<8x128xf32>
      %105 = vector.extract_strided_slice %63 {offsets = [1, 0, 0], sizes = [1, 8, 128], strides = [1, 1, 1]} : vector<6x8x128xf32> to vector<1x8x128xf32>
      %106 = vector.shape_cast %105 : vector<1x8x128xf32> to vector<8x128xf32>
      %107 = vector.extract_strided_slice %63 {offsets = [2, 0, 0], sizes = [1, 8, 128], strides = [1, 1, 1]} : vector<6x8x128xf32> to vector<1x8x128xf32>
      %108 = vector.shape_cast %107 : vector<1x8x128xf32> to vector<8x128xf32>
      %109 = vector.extract_strided_slice %63 {offsets = [3, 0, 0], sizes = [1, 8, 128], strides = [1, 1, 1]} : vector<6x8x128xf32> to vector<1x8x128xf32>
      %110 = vector.shape_cast %109 : vector<1x8x128xf32> to vector<8x128xf32>
      %111 = vector.extract_strided_slice %63 {offsets = [4, 0, 0], sizes = [1, 8, 128], strides = [1, 1, 1]} : vector<6x8x128xf32> to vector<1x8x128xf32>
      %112 = vector.shape_cast %111 : vector<1x8x128xf32> to vector<8x128xf32>
      %cst_62 = arith.constant 5.000000e-01 : f32
      %113 = vector.broadcast %cst_62 : f32 to vector<8x128xf32>
      %114 = arith.mulf %113, %99 : vector<8x128xf32>
      %115 = arith.addf %87, %114 : vector<8x128xf32>
      %cst_63 = arith.constant 5.000000e-01 : f32
      %116 = vector.broadcast %cst_63 : f32 to vector<8x128xf32>
      %117 = arith.mulf %116, %110 : vector<8x128xf32>
      %118 = arith.addf %106, %117 : vector<8x128xf32>
      %119 = arith.minimumf %115, %118 : vector<8x128xf32>
      %cst_64 = arith.constant 5.000000e-01 : f32
      %120 = vector.broadcast %cst_64 : f32 to vector<8x128xf32>
      %121 = arith.mulf %120, %99 : vector<8x128xf32>
      %122 = arith.subf %87, %121 : vector<8x128xf32>
      %cst_65 = arith.constant 5.000000e-01 : f32
      %123 = vector.broadcast %cst_65 : f32 to vector<8x128xf32>
      %124 = arith.mulf %123, %110 : vector<8x128xf32>
      %125 = arith.subf %106, %124 : vector<8x128xf32>
      %126 = arith.maximumf %122, %125 : vector<8x128xf32>
      %127 = arith.subf %119, %126 : vector<8x128xf32>
      %cst_66 = arith.constant 0.000000e+00 : f32
      %128 = vector.broadcast %cst_66 : f32 to vector<8x128xf32>
      %129 = arith.maximumf %127, %128 : vector<8x128xf32>
      %cst_67 = arith.constant 5.000000e-01 : f32
      %130 = vector.broadcast %cst_67 : f32 to vector<8x128xf32>
      %131 = arith.mulf %130, %104 : vector<8x128xf32>
      %132 = arith.addf %94, %131 : vector<8x128xf32>
      %cst_68 = arith.constant 5.000000e-01 : f32
      %133 = vector.broadcast %cst_68 : f32 to vector<8x128xf32>
      %134 = arith.mulf %133, %112 : vector<8x128xf32>
      %135 = arith.addf %108, %134 : vector<8x128xf32>
      %136 = arith.minimumf %132, %135 : vector<8x128xf32>
      %cst_69 = arith.constant 5.000000e-01 : f32
      %137 = vector.broadcast %cst_69 : f32 to vector<8x128xf32>
      %138 = arith.mulf %137, %104 : vector<8x128xf32>
      %139 = arith.subf %94, %138 : vector<8x128xf32>
      %cst_70 = arith.constant 5.000000e-01 : f32
      %140 = vector.broadcast %cst_70 : f32 to vector<8x128xf32>
      %141 = arith.mulf %140, %112 : vector<8x128xf32>
      %142 = arith.subf %108, %141 : vector<8x128xf32>
      %143 = arith.maximumf %139, %142 : vector<8x128xf32>
      %144 = arith.subf %136, %143 : vector<8x128xf32>
      %cst_71 = arith.constant 0.000000e+00 : f32
      %145 = vector.broadcast %cst_71 : f32 to vector<8x128xf32>
      %146 = arith.maximumf %144, %145 : vector<8x128xf32>
      %147 = arith.mulf %129, %146 : vector<8x128xf32>
      %148 = arith.mulf %99, %104 : vector<8x128xf32>
      %149 = math.absf %148 : vector<8x128xf32>
      %150 = arith.mulf %110, %112 : vector<8x128xf32>
      %151 = math.absf %150 : vector<8x128xf32>
      %152 = arith.addf %149, %151 : vector<8x128xf32>
      %153 = arith.subf %152, %147 : vector<8x128xf32>
      %cst_72 = arith.constant 9.99999997E-7 : f32
      %154 = vector.broadcast %cst_72 : f32 to vector<8x128xf32>
      %155 = arith.addf %153, %154 : vector<8x128xf32>
      %156 = arith.divf %147, %155 : vector<8x128xf32>
      %c0_73 = arith.constant 0 : index
      %c0_74 = arith.constant 0 : index
      %c2_75 = arith.constant 2 : index
      %c0_76 = arith.constant 0 : index
      %c0_77 = arith.constant 0 : index
      %157 = vector.load %arg9[%c0_73, %c0_74, %c2_75, %c0_76, %c0_77] : memref<1x1x6x8x128xf32, #tpu.memory_space<vmem>>, vector<1x1x1x8x128xf32>
      %158 = vector.shape_cast %157 : vector<1x1x1x8x128xf32> to vector<8x128xf32>
      %159 = arith.mulf %65, %156 : vector<8x128xf32>
      %160 = arith.subf %80, %159 : vector<8x128xf32>
      %161 = arith.select %69, %160, %70 : vector<8x128xi1>, vector<8x128xf32>
      %162 = arith.addf %158, %161 : vector<8x128xf32>
      %c0_78 = arith.constant 0 : index
      %c0_79 = arith.constant 0 : index
      %c2_80 = arith.constant 2 : index
      %c0_81 = arith.constant 0 : index
      %c0_82 = arith.constant 0 : index
      %163 = vector.load %arg9[%c0_78, %c0_79, %c2_80, %c0_81, %c0_82] : memref<1x1x6x8x128xf32, #tpu.memory_space<vmem>>, vector<1x1x1x8x128xf32>
      %164 = vector.shape_cast %163 : vector<1x1x1x8x128xf32> to vector<8x128xf32>
      %165 = vector.shape_cast %162 : vector<8x128xf32> to vector<1x1x1x8x128xf32>
      tpu.vector_store %arg9[%c0_78, %c0_79, %c2_80, %c0_81, %c0_82], %165 {strides = array<i32>} : memref<1x1x6x8x128xf32, #tpu.memory_space<vmem>>, vector<1x1x1x8x128xf32>,
      %166 = arith.subf %87, %106 : vector<8x128xf32>
      %167 = arith.subf %94, %108 : vector<8x128xf32>
      %168 = vector.extract_strided_slice %61 {offsets = [3, 0, 0], sizes = [1, 8, 128], strides = [1, 1, 1]} : vector<5x8x128xf32> to vector<1x8x128xf32>
      %169 = vector.shape_cast %168 : vector<1x8x128xf32> to vector<8x128xf32>
      %170 = vector.broadcast %10 : f32 to vector<8x128xf32>
      %171 = arith.mulf %110, %170 : vector<8x128xf32>
      %cst_83 = arith.constant 1.000000e-16 : f32
      %172 = vector.broadcast %cst_83 : f32 to vector<8x128xf32>
      %173 = arith.addf %171, %172 : vector<8x128xf32>
      %174 = math.log %173 : vector<8x128xf32>
      %175 = arith.subf %169, %174 : vector<8x128xf32>
      %176 = vector.extract_strided_slice %61 {offsets = [4, 0, 0], sizes = [1, 8, 128], strides = [1, 1, 1]} : vector<5x8x128xf32> to vector<1x8x128xf32>
      %177 = vector.shape_cast %176 : vector<1x8x128xf32> to vector<8x128xf32>
      %178 = vector.broadcast %12 : f32 to vector<8x128xf32>
      %179 = arith.mulf %112, %178 : vector<8x128xf32>
      %cst_84 = arith.constant 1.000000e-16 : f32
      %180 = vector.broadcast %cst_84 : f32 to vector<8x128xf32>
      %181 = arith.addf %179, %180 : vector<8x128xf32>
      %182 = math.log %181 : vector<8x128xf32>
      %183 = arith.subf %177, %182 : vector<8x128xf32>
      %c0_85 = arith.constant 0 : index
      %c0_86 = arith.constant 0 : index
      %c4 = arith.constant 4 : index
      %c0_87 = arith.constant 0 : index
      %c0_88 = arith.constant 0 : index
      %184 = vector.load %arg9[%c0_85, %c0_86, %c4, %c0_87, %c0_88] : memref<1x1x6x8x128xf32, #tpu.memory_space<vmem>>, vector<1x1x1x8x128xf32>
      %185 = vector.shape_cast %184 : vector<1x1x1x8x128xf32> to vector<8x128xf32>
      %186 = arith.mulf %166, %166 : vector<8x128xf32>
      %187 = arith.mulf %167, %167 : vector<8x128xf32>
      %188 = arith.addf %186, %187 : vector<8x128xf32>
      %189 = arith.mulf %175, %175 : vector<8x128xf32>
      %190 = arith.addf %188, %189 : vector<8x128xf32>
      %191 = arith.mulf %183, %183 : vector<8x128xf32>
      %192 = arith.addf %190, %191 : vector<8x128xf32>
      %193 = arith.select %69, %192, %70 : vector<8x128xi1>, vector<8x128xf32>
      %194 = arith.addf %185, %193 : vector<8x128xf32>
      %c0_89 = arith.constant 0 : index
      %c0_90 = arith.constant 0 : index
      %c4_91 = arith.constant 4 : index
      %c0_92 = arith.constant 0 : index
      %c0_93 = arith.constant 0 : index
      %195 = vector.load %arg9[%c0_89, %c0_90, %c4_91, %c0_92, %c0_93] : memref<1x1x6x8x128xf32, #tpu.memory_space<vmem>>, vector<1x1x1x8x128xf32>
      %196 = vector.shape_cast %195 : vector<1x1x1x8x128xf32> to vector<8x128xf32>
      %197 = vector.shape_cast %194 : vector<8x128xf32> to vector<1x1x1x8x128xf32>
      tpu.vector_store %arg9[%c0_89, %c0_90, %c4_91, %c0_92, %c0_93], %197 {strides = array<i32>} : memref<1x1x6x8x128xf32, #tpu.memory_space<vmem>>, vector<1x1x1x8x128xf32>,
      %198 = vector.extract_strided_slice %63 {offsets = [5, 0, 0], sizes = [1, 8, 128], strides = [1, 1, 1]} : vector<6x8x128xf32> to vector<1x8x128xf32>
      %199 = vector.shape_cast %198 : vector<1x8x128xf32> to vector<8x128xf32>
      %c0_94 = arith.constant 0 : index
      %c0_95 = arith.constant 0 : index
      %c0_96 = arith.constant 0 : index
      %c0_97 = arith.constant 0 : index
      %200 = vector.load %arg7[%c0_94, %c0_95, %c0_96, %c0_97] : memref<1x4x8x128xf32, #tpu.memory_space<vmem>>, vector<1x1x8x128xf32>
      %201 = vector.shape_cast %200 : vector<1x1x8x128xf32> to vector<8x128xf32>
      %c0_98 = arith.constant 0 : index
      %c1_99 = arith.constant 1 : index
      %c0_100 = arith.constant 0 : index
      %c0_101 = arith.constant 0 : index
      %202 = vector.load %arg7[%c0_98, %c1_99, %c0_100, %c0_101] : memref<1x4x8x128xf32, #tpu.memory_space<vmem>>, vector<1x1x8x128xf32>
      %203 = vector.shape_cast %202 : vector<1x1x8x128xf32> to vector<8x128xf32>
      %204 = arith.maximumf %201, %203 : vector<8x128xf32>
      %c0_102 = arith.constant 0 : index
      %c2_103 = arith.constant 2 : index
      %c0_104 = arith.constant 0 : index
      %c0_105 = arith.constant 0 : index
      %205 = vector.load %arg7[%c0_102, %c2_103, %c0_104, %c0_105] : memref<1x4x8x128xf32, #tpu.memory_space<vmem>>, vector<1x1x8x128xf32>
      %206 = vector.shape_cast %205 : vector<1x1x8x128xf32> to vector<8x128xf32>
      %207 = arith.maximumf %204, %206 : vector<8x128xf32>
      %c0_106 = arith.constant 0 : index
      %c3_107 = arith.constant 3 : index
      %c0_108 = arith.constant 0 : index
      %c0_109 = arith.constant 0 : index
      %208 = vector.load %arg7[%c0_106, %c3_107, %c0_108, %c0_109] : memref<1x4x8x128xf32, #tpu.memory_space<vmem>>, vector<1x1x8x128xf32>
      %209 = vector.shape_cast %208 : vector<1x1x8x128xf32> to vector<8x128xf32>
      %210 = arith.maximumf %207, %209 : vector<8x128xf32>
      %c0_110 = arith.constant 0 : index
      %c0_111 = arith.constant 0 : index
      %c0_112 = arith.constant 0 : index
      %c0_113 = arith.constant 0 : index
      %211 = vector.load %arg7[%c0_110, %c0_111, %c0_112, %c0_113] : memref<1x4x8x128xf32, #tpu.memory_space<vmem>>, vector<1x1x8x128xf32>
      %212 = vector.shape_cast %211 : vector<1x1x8x128xf32> to vector<8x128xf32>
      %213 = arith.subf %212, %210 : vector<8x128xf32>
      %214 = math.exp %213 : vector<8x128xf32>
      %215 = arith.addf %70, %214 : vector<8x128xf32>
      %cst_114 = arith.constant 0.000000e+00 : f32
      %216 = vector.broadcast %cst_114 : f32 to vector<8x128xf32>
      %217 = arith.cmpf oeq, %199, %216 : vector<8x128xf32>
      %218 = arith.select %217, %212, %70 : vector<8x128xi1>, vector<8x128xf32>
      %219 = arith.addf %70, %218 : vector<8x128xf32>
      %c0_115 = arith.constant 0 : index
      %c1_116 = arith.constant 1 : index
      %c0_117 = arith.constant 0 : index
      %c0_118 = arith.constant 0 : index
      %220 = vector.load %arg7[%c0_115, %c1_116, %c0_117, %c0_118] : memref<1x4x8x128xf32, #tpu.memory_space<vmem>>, vector<1x1x8x128xf32>
      %221 = vector.shape_cast %220 : vector<1x1x8x128xf32> to vector<8x128xf32>
      %222 = arith.subf %221, %210 : vector<8x128xf32>
      %223 = math.exp %222 : vector<8x128xf32>
      %224 = arith.addf %215, %223 : vector<8x128xf32>
      %cst_119 = arith.constant 1.000000e+00 : f32
      %225 = vector.broadcast %cst_119 : f32 to vector<8x128xf32>
      %226 = arith.cmpf oeq, %199, %225 : vector<8x128xf32>
      %227 = arith.select %226, %221, %70 : vector<8x128xi1>, vector<8x128xf32>
      %228 = arith.addf %219, %227 : vector<8x128xf32>
      %c0_120 = arith.constant 0 : index
      %c2_121 = arith.constant 2 : index
      %c0_122 = arith.constant 0 : index
      %c0_123 = arith.constant 0 : index
      %229 = vector.load %arg7[%c0_120, %c2_121, %c0_122, %c0_123] : memref<1x4x8x128xf32, #tpu.memory_space<vmem>>, vector<1x1x8x128xf32>
      %230 = vector.shape_cast %229 : vector<1x1x8x128xf32> to vector<8x128xf32>
      %231 = arith.subf %230, %210 : vector<8x128xf32>
      %232 = math.exp %231 : vector<8x128xf32>
      %233 = arith.addf %224, %232 : vector<8x128xf32>
      %cst_124 = arith.constant 2.000000e+00 : f32
      %234 = vector.broadcast %cst_124 : f32 to vector<8x128xf32>
      %235 = arith.cmpf oeq, %199, %234 : vector<8x128xf32>
      %236 = arith.select %235, %230, %70 : vector<8x128xi1>, vector<8x128xf32>
      %237 = arith.addf %228, %236 : vector<8x128xf32>
      %c0_125 = arith.constant 0 : index
      %c3_126 = arith.constant 3 : index
      %c0_127 = arith.constant 0 : index
      %c0_128 = arith.constant 0 : index
      %238 = vector.load %arg7[%c0_125, %c3_126, %c0_127, %c0_128] : memref<1x4x8x128xf32, #tpu.memory_space<vmem>>, vector<1x1x8x128xf32>
      %239 = vector.shape_cast %238 : vector<1x1x8x128xf32> to vector<8x128xf32>
      %240 = arith.subf %239, %210 : vector<8x128xf32>
      %241 = math.exp %240 : vector<8x128xf32>
      %242 = arith.addf %233, %241 : vector<8x128xf32>
      %cst_129 = arith.constant 3.000000e+00 : f32
      %243 = vector.broadcast %cst_129 : f32 to vector<8x128xf32>
      %244 = arith.cmpf oeq, %199, %243 : vector<8x128xf32>
      %245 = arith.select %244, %239, %70 : vector<8x128xi1>, vector<8x128xf32>
      %246 = arith.addf %237, %245 : vector<8x128xf32>
      %247 = math.log %242 : vector<8x128xf32>
      %248 = arith.addf %210, %247 : vector<8x128xf32>
      %c0_130 = arith.constant 0 : index
      %c0_131 = arith.constant 0 : index
      %c5 = arith.constant 5 : index
      %c0_132 = arith.constant 0 : index
      %c0_133 = arith.constant 0 : index
      %249 = vector.load %arg9[%c0_130, %c0_131, %c5, %c0_132, %c0_133] : memref<1x1x6x8x128xf32, #tpu.memory_space<vmem>>, vector<1x1x1x8x128xf32>
      %250 = vector.shape_cast %249 : vector<1x1x1x8x128xf32> to vector<8x128xf32>
      %251 = arith.subf %248, %246 : vector<8x128xf32>
      %252 = arith.select %69, %251, %70 : vector<8x128xi1>, vector<8x128xf32>
      %253 = arith.addf %250, %252 : vector<8x128xf32>
      %c0_134 = arith.constant 0 : index
      %c0_135 = arith.constant 0 : index
      %c5_136 = arith.constant 5 : index
      %c0_137 = arith.constant 0 : index
      %c0_138 = arith.constant 0 : index
      %254 = vector.load %arg9[%c0_134, %c0_135, %c5_136, %c0_137, %c0_138] : memref<1x1x6x8x128xf32, #tpu.memory_space<vmem>>, vector<1x1x1x8x128xf32>
      %255 = vector.shape_cast %254 : vector<1x1x1x8x128xf32> to vector<8x128xf32>
      %256 = vector.shape_cast %253 : vector<8x128xf32> to vector<1x1x1x8x128xf32>
      tpu.vector_store %arg9[%c0_134, %c0_135, %c5_136, %c0_137, %c0_138], %256 {strides = array<i32>} : memref<1x1x6x8x128xf32, #tpu.memory_space<vmem>>, vector<1x1x1x8x128xf32>,
    } else {
    }
    return
  }
  func.func @transform_0(%arg0: i32, %arg1: i32, %arg2: i32, %arg3: memref<3x2xi32, #tpu.memory_space<smem>>, %arg4: memref<3x2xi32, #tpu.memory_space<smem>>) -> (i32, i32) {
    %c0_i32 = arith.constant 0 : i32
    %c0_i32_0 = arith.constant 0 : i32
    %c0_i32_1 = arith.constant 0 : i32
    return %c0_i32, %c0_i32_0 : i32, i32
  }
  func.func @transform_1(%arg0: i32, %arg1: i32, %arg2: i32, %arg3: memref<3x2xi32, #tpu.memory_space<smem>>, %arg4: memref<3x2xi32, #tpu.memory_space<smem>>) -> (i32, i32, i32, i32) {
    %c1_i32 = arith.constant 1 : i32
    %0 = arith.muli %arg0, %c1_i32 : i32
    %1 = arith.addi %0, %arg2 : i32
    %c0_i32 = arith.constant 0 : i32
    %c0_i32_0 = arith.constant 0 : i32
    %c0_i32_1 = arith.constant 0 : i32
    return %arg1, %c0_i32, %1, %c0_i32_0 : i32, i32, i32, i32
  }
  func.func @transform_2(%arg0: i32, %arg1: i32, %arg2: i32, %arg3: memref<3x2xi32, #tpu.memory_space<smem>>, %arg4: memref<3x2xi32, #tpu.memory_space<smem>>) -> (i32, i32, i32, i32) {
    %c1_i32 = arith.constant 1 : i32
    %0 = arith.muli %arg0, %c1_i32 : i32
    %1 = arith.addi %0, %arg2 : i32
    %2 = arith.index_cast %arg1 : i32 to index
    %3 = arith.index_cast %1 : i32 to index
    %4 = memref.load %arg4[%2, %3] : memref<3x2xi32, #tpu.memory_space<smem>>
    %c0_i32 = arith.constant 0 : i32
    %c0_i32_0 = arith.constant 0 : i32
    %c0_i32_1 = arith.constant 0 : i32
    return %arg1, %c0_i32, %4, %c0_i32_0 : i32, i32, i32, i32
  }
  func.func @transform_3(%arg0: i32, %arg1: i32, %arg2: i32, %arg3: memref<3x2xi32, #tpu.memory_space<smem>>, %arg4: memref<3x2xi32, #tpu.memory_space<smem>>) -> (i32, i32, i32, i32) {
    %c1_i32 = arith.constant 1 : i32
    %0 = arith.muli %arg0, %c1_i32 : i32
    %1 = arith.addi %0, %arg2 : i32
    %c0_i32 = arith.constant 0 : i32
    %c0_i32_0 = arith.constant 0 : i32
    %c0_i32_1 = arith.constant 0 : i32
    return %arg1, %c0_i32, %1, %c0_i32_0 : i32, i32, i32, i32
  }
  func.func @transform_4(%arg0: i32, %arg1: i32, %arg2: i32, %arg3: memref<3x2xi32, #tpu.memory_space<smem>>, %arg4: memref<3x2xi32, #tpu.memory_space<smem>>) -> (i32, i32, i32, i32, i32) {
    %c0_i32 = arith.constant 0 : i32
    %c0_i32_0 = arith.constant 0 : i32
    %c0_i32_1 = arith.constant 0 : i32
    %c0_i32_2 = arith.constant 0 : i32
    return %arg0, %arg1, %c0_i32, %c0_i32_0, %c0_i32_1 : i32, i32, i32, i32, i32
  }
}

</mosaic_0001>

<bundles_post_ra>
// kernel: yolo_loss.1
= control target key start
LH: loop header
LB: loop body
LE: loop exit
PB: predicated region body
PF: predicated region fallthrough
CT: control target
= control target key end

     0   :  { %s1479_s0 = inlined_call_operand.vmem [shape: s32[3,2], index: 0, kind: input, shape index: {}]   ;;  %s1480_s2 = inlined_call_operand.vmem [shape: f32[3,4], index: 2, kind: input, shape index: {}]   ;;  %s1481_s3 = inlined_call_operand.vmem [shape: f32[3,5,16,128], index: 3, kind: input, shape index: {}]   ;;  %s1482_s4 = inlined_call_operand.vmem [shape: f32[3,4,16,128], index: 4, kind: input, shape index: {}]   ;;  %s1483_s5 = inlined_call_operand.vmem [shape: f32[3,6,16,128], index: 5, kind: input, shape index: {}]   ;;  %s1484_s6 = inlined_call_operand.vmem [shape: f32[2,3,6,8,128], index: 6, kind: output, shape index: {}]   ;;  %s1485_s1 = inlined_call_operand.vmem [shape: s32[3,2], index: 1, kind: input, shape index: {}]  }
   0x1   :  { %1489 = sst [smem:[#allocation14_spill]] %s1480_s2  ;;  %s11_s23 = sshll.u32 %s1479_s0, 4  ;;  %s12_s23 = int_to_ptr.vmem [resolvable:$true] %s11_s23 }
   0x2   :  { %1490 = sst [smem:[#allocation15_spill]] %s1481_s3  ;;  %s15_s26 = sshll.u32 %s1485_s1, 4  ;;  %s16_s26 = int_to_ptr.vmem [resolvable:$true] %s15_s26 }
   0x3   :  { %1491 = sst [smem:[#allocation16_spill]] %s1484_s6  ;;  %s1030_s27 = scalar_lea.vmem %s12_s23, 64 }
   0x4   :  { %p1031_p0 = scmp.ne.s32.totalorder %s12_s23, %s1030_s27  ;;  %p1035_p1 = scmp.lt.s32.totalorder %s12_s23, %s12_s23 }
   0x5   :  { %p1036_p2 = scmp.lt.s32.totalorder %s1030_s27, %s1030_s27 }
   0x7   :  { %p1037_p3 = por %p1036_p2, %p1035_p1 }
   0x9   :  { %p1038_p4 = pnand %p1037_p3, %p1031_p0 }
   0xb   :  { %1041 = shalt.err (!%p1038_p4)  }
   0xc   :  { %s1147_s28 = smov [#allocation3]   ;;  %s1042_s29 = scalar_lea.vmem %s16_s26, 64 }
   0xd   :  { %14 = dma.vmem_to_smem %s12_s23, 64, %s1147_s28, [#allocation2] }
   0xe   :  { %p1043_p5 = scmp.ne.s32.totalorder %s16_s26, %s1042_s29  ;;  %p1047_p6 = scmp.lt.s32.totalorder %s16_s26, %s16_s26 }
   0xf   :  { %p1048_p7 = scmp.lt.s32.totalorder %s1042_s29, %s1042_s29 }
  0x11   :  { %p1049_p8 = por %p1048_p7, %p1047_p6 }
  0x13   :  { %p1050_p9 = pnand %p1049_p8, %p1043_p5 }
  0x15   :  { %1053 = shalt.err (!%p1050_p9)  }
  0x16   :  { %s1148_s0 = smov [#allocation4]  }
  0x17   :  { %18 = dma.vmem_to_smem %s16_s26, 64, %s1148_s0, [#allocation2] }
  0x18   :  { %1105 = dma.done.wait [#allocation2], 128 }
  0x19   :  { %1106 = vsyncadd [#allocation2], 4294967168 }
  0x1a   :  { %20 = sfence }
  0x1b   :  { %21 = vsyncpa [#allocation6], 0  ;;  %s1192_s1 = smov 0   ;;  %s1194_s30 = smov 0  }
  0x1c   :  { %s1196_s7 = smov 0   ;;  %s1198_s8 = smov 0  }
  0x1d   :  { %s1200_s9 = smov 0   ;;  %s1202_s10 = smov 0  }
  0x1e   :  { %s1204_s11 = smov 0   ;;  %s1206_s12 = smov 0  }
  0x1f   :  { %s1208_s13 = smov 0  }
  0x20 LB: > { %s42_s14 = sadd.s32 1, %s1137_s11  ;;  %s46_s15 = sadd.s32 1, %s1141_s12  ;;  %s1145_s13 = sphi %s1208_s13, %s27_s13   ;;  %s1141_s12 = sphi %s1206_s12, %s1513_s12   ;;  %s1137_s11 = sphi %s1204_s11, %s1512_s11   ;;  %s1133_s10 = sphi %s1202_s10, %s1511_s10   ;;  %s1129_s9 = sphi %s1200_s9, %s1510_s9   ;;  %s1125_s8 = sphi %s1198_s8, %s1509_s8   ;;  %s1121_s7 = sphi %s1196_s7, %s1508_s7   ;;  %s1117_s30 = sphi %s1194_s30, %s1507_s30   ;;  %s1113_s1 = sphi %s1192_s1, %s1506_s1  }
  0x21   : > { %p44_p10 = scmp.ge.s32.totalorder %s42_s14, 3  ;;  %p85_p11 = scmp.ne.s32.totalorder %s1125_s8, %s1121_s7 }
  0x22   : > { %p86_p12 = scmp.eq.s32.totalorder %s1145_s13, 0  ;;  %s102_s18 = sshra.s32 %s1141_s12, 7 }
  0x23   : > { %s1515_s14 = smov (%p44_p10, %s42_s14), 0  ;;  %s1517_s15 = smov (!%p44_p10, %s46_s15), %s1141_s12 }
  0x24   : > { %1492 = sst [smem:[#allocation12_spill]] %s1515_s14  ;;  %s1247_s17 = ssub.s32 %s1137_s11, %s1515_s14 }
  0x25   : > { %p48_p13 = scmp.ge.s32.totalorder %s1517_s15, 2  ;;  %p1253_p0 = por %p86_p12, %p85_p11 }
  0x26   : > { %s104_s20 = sadd.s32 %s1137_s11, %s102_s18  ;;  %s107_s22 = sand.u32 127, %s1141_s12 }
  0x27   : > { %s1519_s15 = smov (%p48_p13, %s1517_s15), 0  ;;  %s865_s21 = sshll.u32 %s104_s20, 7 }
  0x28   : > { %1494 = sst [smem:[#allocation13_spill]] %s1519_s15  ;;  %s74_s23 = ssub.s32 %s1141_s12, %s1519_s15 }
  0x29   : > { %s78_s24 = sadd.s32 1, %s1125_s8  ;;  %s75_s25 = sor.u32 %s74_s23, %s1247_s17 }
  0x2a   : > { %s1265_s26 = sadd.s32 %s865_s21, %s107_s22  ;;  %p76_p1 = scmp.eq.s32.totalorder %s75_s25, 0 }
  0x2b   : > { %s111_s27 = sshra.s32 %s1519_s15, 7  ;;  %s116_s29 = sand.u32 127, %s1519_s15 }
  0x2c   : > { %s113_s28 = sadd.s32 %s111_s27, %s1515_s14  ;;  %s109_s18 = sld [smem:[#allocation4 + %s1265_s26]] }
  0x2d   : > { %s1271_s0 = scalar_select %p76_p1, %s1125_s8, %s78_s24  }
  0x2e   : > { %s866_s20 = sshll.u32 %s113_s28, 7  ;;  %p131_p2 = scmp.ne.s32.totalorder %s1117_s30, %s1113_s1 }
  0x2f   : > { %s117_s16 = sadd.s32 %s866_s20, %s116_s29  ;;  %p867_p3 = scmp.ge.s32.totalorder %s1145_s13, 1 }
  0x30   : > { %s118_s6 = sld [smem:[#allocation4 + %s117_s16]]  ;;  %p1279_p4 = por %p131_p2, %p86_p12 }
  0x31   : > { %p206_p5 = scmp.lt.s32.totalorder %s1145_s13, 7  ;;  %s1496_s22 = sadd.s32 4294967295, %s1145_s13  }
  0x32   : > { %p1286_p6 = scmp.eq.s32.totalorder %s1496_s22, 0  ;;  %s1499_s2 = sld [smem:[#allocation14_spill]] }
  0x33   : > { %p1290_p7 = pnand %p867_p3, %p206_p5  ;;  %s124_s28 = sadd.s32 1, %s1117_s30 }
  0x35   : > { %s1498_s24 = scalar_select %p1290_p7, 1, 0 }
  0x36   : > { %p912_p8 = pneg %p1290_p7  ;;  %s120_s29 = ssub.s32 %s109_s18, %s118_s6 }
  0x37   : > { %s121_s20 = sor.u32 %s120_s29, %s1247_s17 }
  0x38   : > { %s219_s16 = sshll.u32 %s1499_s2, 4  ;;  %p1303_p9 = pnand %p1286_p6, %p912_p8  ;;  %s220_s16 = int_to_ptr.vmem [resolvable:$true] %s219_s16 }
  0x39   : > { %p122_p10 = scmp.eq.s32.totalorder %s121_s20, 0  ;;  %s1054_s14 = scalar_lea.vmem %s220_s16, 64 }
  0x3a   : > { %p1055_p11 = scmp.ne.s32.totalorder %s220_s16, %s1054_s14  ;;  %p1056_p12 = pneg %p1303_p9 }
  0x3b   : > { %s1308_s15 = scalar_select %p122_p10, %s1117_s30, %s124_s28  }
  0x3c   : > { %p1057_p13 = pnand %p1056_p12, %p1055_p11  ;;  %p1062_p2 = scmp.lt.s32.totalorder %s220_s16, %s220_s16 }
  0x3d   : > { %p1063_p3 = scmp.lt.s32.totalorder %s1054_s14, %s1054_s14 }
  0x3e   : > { %p1058_p1 = pneg %p1057_p13 }
  0x3f   : > { %p1064_p5 = por %p1063_p3, %p1062_p2 }
  0x41   : > { %p1065_p7 = pnand %p1064_p5, %p1058_p1 }
  0x43   : > { %1068 = shalt.err (!%p1065_p7)
}
  0x44   : > { %s1149_s6 = smov [#allocation5]   ;;  %p869_p8 = scmp.ge.s32.totalorder %s1145_s13, 6 }
  0x45   : > { %915 = dma.vmem_to_smem (!%p1303_p9), %s220_s16, 64, %s1149_s6, [#allocation6]  }
  0x46   : > { %226 = sbr.rel (%p869_p8) target bundleno = 109 (0x6d), region = 20 }
  0x4b   : > { %229 = sbr.rel (!%p1253_p0) target bundleno = 87 (0x57), region = 24  ;;  %s231_s17 = sand.u32 (%p1253_p0), 1, %s1125_s8  }
  0x4c   : > { %s901_s18 = smul.u32 (%p1253_p0), 10, %s1137_s11  ;;  %s1501_s3 = sld [smem:[#allocation15_spill]] (%p1253_p0) }
  0x4d   : > { %s900_s25 = smul.u32 (%p1253_p0), 40, %s231_s17 }
  0x4e   : > { %s236_s14 = sadd.s32 (%p1253_p0), %s1141_s12, %s901_s18 }
  0x4f   : > { %s870_s27 = sshll.u32 (%p1253_p0), %s236_s14, 3  ;;  %s233_s16 = scalar_lea.vmem (%p1253_p0), [#allocation7], %s900_s25 }
  0x52   : > { %s238_s20 = scalar_lea.vmem %s1501_s3, %s870_s27 }
  0x53   : > { %v275_v0 = vld [vmem:[%s238_s20] sm:$0xff]  ;;  %v277_v1 = vld [vmem:[%s238_s20 + $0x10] sm:$0xff] }
  0x54   : > { %v279_v2 = vld [vmem:[%s238_s20 + $0x20] sm:$0xff]  ;;  %276 = vst [vmem:[%s233_s16] sm:$0xff] %v275_v0  ;;  %278 = vst [vmem:[%s233_s16 + $0x8] sm:$0xff] %v277_v1  ;;  %v281_v3 = vld [vmem:[%s238_s20 + $0x30] sm:$0xff] }
  0x55   : > { %280 = vst [vmem:[%s233_s16 + $0x10] sm:$0xff] %v279_v2  ;;  %v283_v4 = vld [vmem:[%s238_s20 + $0x40] sm:$0xff]  ;;  %282 = vst [vmem:[%s233_s16 + $0x18] sm:$0xff] %v281_v3 }
  0x56   : > { %284 = vst [vmem:[%s233_s16 + $0x20] sm:$0xff] %v283_v4 }
  0x57 PF: > { %290 = sbr.rel (!%p1279_p4) target bundleno = 99 (0x63), region = 62  ;;  %s303_s22 = sld [smem:[#allocation4 + %s1265_s26]] (%p1279_p4) }
  0x58   : > { %s292_s6 = sand.u32 (%p1279_p4), 1, %s1117_s30   ;;  %s873_s17 = sshll.u32 (%p1279_p4), %s1137_s11, 3 }
  0x59   : > { %s871_s18 = sshll.u32 (%p1279_p4), %s292_s6, 5 }
  0x5a   : > { %s294_s20 = scalar_lea.vmem (%p1279_p4), [#allocation8], %s871_s18 }
  0x5d   : > { %s305_s14 = sadd.s32 %s873_s17, %s303_s22 }
  0x5e   : > { %s874_s25 = sshll.u32 %s305_s14, 3 }
  0x5f   : > { %s307_s29 = scalar_lea.vmem %s1482_s4, %s874_s25 }
  0x60   : > { %v342_v5 = vld [vmem:[%s307_s29] sm:$0xff]  ;;  %v344_v6 = vld [vmem:[%s307_s29 + $0x10] sm:$0xff] }
  0x61   : > { %v346_v7 = vld [vmem:[%s307_s29 + $0x20] sm:$0xff]  ;;  %343 = vst [vmem:[%s294_s20] sm:$0xff] %v342_v5  ;;  %345 = vst [vmem:[%s294_s20 + $0x8] sm:$0xff] %v344_v6  ;;  %v348_v8 = vld [vmem:[%s307_s29 + $0x30] sm:$0xff] }
  0x62   : > { %347 = vst [vmem:[%s294_s20 + $0x10] sm:$0xff] %v346_v7  ;;  %349 = vst [vmem:[%s294_s20 + $0x18] sm:$0xff] %v348_v8 }
  0x63 PF: > { %355 = sbr.rel (!%p1253_p0) target bundleno = 109 (0x6d), region = 100  ;;  %s357_s26 = sand.u32 (%p1253_p0), 1, %s1125_s8  }
  0x64   : > { %s903_s21 = smul.u32 (%p1253_p0), 12, %s1137_s11 }
  0x65   : > { %s902_s16 = smul.u32 (%p1253_p0), 48, %s357_s26 }
  0x66   : > { %s362_s22 = sadd.s32 (%p1253_p0), %s1141_s12, %s903_s21 }
  0x67   : > { %s875_s6 = sshll.u32 (%p1253_p0), %s362_s22, 3  ;;  %s359_s25 = scalar_lea.vmem (%p1253_p0), [#allocation9], %s902_s16 }
  0x68   : > { %s364_s18 = scalar_lea.vmem %s1483_s5, %s875_s6 }
  0x69   : > { %v403_v9 = vld [vmem:[%s364_s18] sm:$0xff]  ;;  %v405_v10 = vld [vmem:[%s364_s18 + $0x10] sm:$0xff] }
  0x6a   : > { %v407_v11 = vld [vmem:[%s364_s18 + $0x20] sm:$0xff]  ;;  %404 = vst [vmem:[%s359_s25] sm:$0xff] %v403_v9  ;;  %406 = vst [vmem:[%s359_s25 + $0x8] sm:$0xff] %v405_v10  ;;  %v409_v12 = vld [vmem:[%s364_s18 + $0x30] sm:$0xff] }
  0x6b   : > { %408 = vst [vmem:[%s359_s25 + $0x10] sm:$0xff] %v407_v11  ;;  %v411_v13 = vld [vmem:[%s364_s18 + $0x40] sm:$0xff]  ;;  %v413_v14 = vld [vmem:[%s364_s18 + $0x50] sm:$0xff]  ;;  %410 = vst [vmem:[%s359_s25 + $0x18] sm:$0xff] %v409_v12 }
  0x6c   : > { %412 = vst [vmem:[%s359_s25 + $0x20] sm:$0xff] %v411_v13  ;;  %414 = vst [vmem:[%s359_s25 + $0x28] sm:$0xff] %v413_v14 }
  0x6d PF: > { %p1502_p0 = scmp.ne.s32.totalorder %s1498_s24, 0 }
  0x6f   : > { %423 = sbr.rel (%p1502_p0) target bundleno = 238 (0xee), region = 138 }
  0x74   : > { %1108 = dma.done.wait (%p1286_p6), [#allocation6], 64  }
  0x75   : > { %1110 = vsyncadd (%p1286_p6), [#allocation6], 4294967232  ;;  %s430_s19 = sand.u32 1, %s1121_s7   ;;  %s437_s27 = sand.u32 1, %s1113_s1  }
  0x76   : > { %s904_s28 = smul.u32 40, %s430_s19  ;;  %s878_s29 = sshll.u32 %s437_s27, 5 }
  0x77   : > { %s905_s20 = smul.u32 48, %s430_s19  ;;  %s1349_s21 = scalar_lea.vmem [#allocation8], %s878_s29 }
  0x78   : > { %s1347_s26 = scalar_lea.vmem [#allocation7], %s904_s28 }
  0x79   : > { %s1351_s16 = scalar_lea.vmem [#allocation9], %s905_s20 }
  0x7a   : > { %450 = sfence }
  0x7b   : > { %p493_p4 = scmp.lt.s32.totalorder %s1133_s10, 1  ;;  %p495_p6 = scmp.lt.s32.totalorder %s1129_s9, 2  ;;  %v521_v15 = vld [vmem:[%s1347_s26] sm:$0xff]  ;;  %v522_v16 = vld [vmem:[%s1351_s16] sm:$0xff]  ;;  %v1150_v19 = vmov 0.0  }
  0x7c   : > { %s880_s1 = sshll.u32 %s1129_s9, 7  ;;  %s548_s7 = sshra.s32 %s1133_s10, 7  ;;  %vm524_vm0 = vcmp.eq.f32.partialorder %v522_v16, 0.0  ;;  %v526_v17 = vand.u32 2147483647, %v521_v15  ;;  %vm523_vm1 = vcmp.eq.f32.partialorder %v522_v16, 1.0 }
  0x7d   : > { %s494_s23 = scalar_select %p493_p4, %s1133_s10, 1  ;;  %v540_v20 = vsel %vm524_vm0, 1.0, %v1150_v19  ;;  %v545_v21 = vsel %vm523_vm1, 1.0, %v1150_v19  ;;  %v525_v25 = vmax.f32 %v521_v15, 0.0 }
  0x7e   : > { %s496_s24 = scalar_select %p495_p6, %s1129_s9, 2  ;;  %v527_v18 = vsub.f32 0.0, %v526_v17 }
  0x7f   : > { %s907_s22 = smul.u32 18, %s494_s23  ;;  %s1362_s6 = sld [smem:[#allocation5 + %s880_s1]] }
  0x80   : > { %s906_s17 = smul.u32 6, %s496_s24  ;;  %s515_s14 = sadd.s32 1, %s880_s1  ;;  %v528_v22 = vmul.f32 1.442695, %v527_v18 }
  0x81   : > { %s1364_s18 = sld [smem:[#allocation5 + %s515_s14]]  ;;  %s517_s25 = sadd.s32 2, %s880_s1 }
  0x82   : > { %s499_s19 = sadd.s32 %s907_s22, %s906_s17  ;;  %s1366_s27 = sld [smem:[#allocation5 + %s517_s25]]  ;;  %994 = vpow2.f32 %v528_v22 }
  0x83   : > { %s879_s28 = sshll.u32 %s499_s19, 3  ;;  %s519_s29 = sadd.s32 3, %s880_s1 }
  0x84   : > { %s1503_s3 = sld [smem:[#allocation16_spill]]  ;;  %s550_s22 = sadd.s32 %s1129_s9, %s548_s7 }
  0x85   : > { %s1373_s24 = sld [smem:[#allocation5 + %s519_s29]]  ;;  %s553_s17 = sand.u32 127, %s1133_s10 }
  0x86   : > { %s885_s1 = sshll.u32 %s550_s22, 7 }
  0x87   : > { %s554_s14 = sadd.s32 %s885_s1, %s553_s17 }
  0x88   : > { %s555_s2 = sld [smem:[#allocation3 + %s554_s14]] }
  0x8a   : > { %s1371_s23 = scalar_lea.vmem %s1503_s3, %s879_s28 }
  0x8b   : > { %509 = vst [vmem:[%s1371_s23 + $0x10] sm:$0xff] %v1150_v19  ;;  %511 = vst [vmem:[%s1371_s23 + $0x20] sm:$0xff] %v1150_v19 }
  0x8c   : > { %512 = vst [vmem:[%s1371_s23 + $0x28] sm:$0xff] %v1150_v19  ;;  %882 = vst [vmem:[%s1371_s23 + $0x8] sm:$0xff] %v540_v20 }
  0x8d   : > { %884 = vst [vmem:[%s1371_s23 + $0x18] sm:$0xff] %v545_v21 }
  0x8e   : > { %p886_p7 = scmp.le.s32.totalorder %s555_s2, 0 }
  0x8f   : > { %v995_v23 = vpop.eup %994 }
  0x90   : > { %v530_v24 = vadd.f32 1.0, %v995_v23 }
  0x92   : > { %996 = vlog2.f32 %v530_v24 }
  0x9f   : > { %v997_v26 = vpop.eup %996 }
  0xa0   : > { %v532_v27 = vmul.f32 0.6931472, %v997_v26 }
  0xa1   : > { %559 = sbr.rel (%p886_p7) target bundleno = 238 (0xee), region = 162 }
  0xa2   : > { %v533_v28 = vadd.f32 %v532_v27, %v525_v25 }
  0xa4   : > { %v535_v29 = vsel %vm524_vm0, %v533_v28, 0.0 }
  0xa5   : > { %537 = vst [vmem:[%s1371_s23] sm:$0xff] %v535_v29 }
  0xa6   : > { %v561_v30 = vld [vmem:[%s1347_s26 + $0x8] sm:$0xff]  ;;  %v562_v31 = vld [vmem:[%s1347_s26 + $0x10] sm:$0xff]  ;;  %v640_v33 = vstv %s1366_s27  ;;  %v1388_v34 = vld [vmem:[%s1347_s26 + $0x18] sm:$0xff] }
  0xa7   : > { %v887_v32 = vmul.f32 -1.442695, %v561_v30  ;;  %v888_v35 = vmul.f32 -1.442695, %v562_v31  ;;  %v1391_v36 = vld [vmem:[%s1347_s26 + $0x20] sm:$0xff]  ;;  %v568_v37 = vld [vmem:[%s1351_s16 + $0x18] sm:$0xff]  ;;  %v646_v44 = vstv %s1373_s24  ;;  %v595_v6 = vstv %s1362_s6 }
  0xa8   : > { %v641_v38 = vmul.f32 %v640_v33, %v568_v37  ;;  %v1395_v39 = vld [vmem:[%s1349_s21] sm:$0xff]  ;;  %v593_v40 = vmul.f32 1.442695, %v1388_v34  ;;  %v1399_v41 = vld [vmem:[%s1349_s21 + $0x8] sm:$0xff]  ;;  %v597_v43 = vmul.f32 1.442695, %v1391_v36  ;;  %v599_v8 = vstv %s1364_s18 }
  0xa9   : > { %998 = vpow2.f32 %v887_v32  ;;  %v569_v42 = vld [vmem:[%s1351_s16 + $0x20] sm:$0xff]  ;;  %v1408_v46 = vld [vmem:[%s1347_s26] sm:$0xff]  ;;  %v667_v48 = vmax.f32 %v1395_v39, %v1399_v41  ;;  %v603_v13 = vmul.f32 0.5, %v568_v37 }
  0xaa   : > { %1000 = vpow2.f32 %v888_v35  ;;  %v1405_v45 = vld [vmem:[%s1349_s21 + $0x10] sm:$0xff]  ;;  %v647_v47 = vmul.f32 %v646_v44, %v569_v42  ;;  %v642_v49 = vadd.f32 1e-16, %v641_v38  ;;  %v1413_v50 = vld [vmem:[%s1349_s21 + $0x18] sm:$0xff]  ;;  %v573_v52 = vand.u32 2147483647, %v1408_v46 }
  0xab   : > { %1002 = vpow2.f32 %v593_v40  ;;  %v670_v51 = vmax.f32 %v667_v48, %v1405_v45  ;;  %v613_v14 = vmul.f32 0.5, %v569_v42  ;;  %v566_v15 = vld [vmem:[%s1351_s16 + $0x8] sm:$0xff]  ;;  %v567_v16 = vld [vmem:[%s1351_s16 + $0x10] sm:$0xff]  ;;  %v624_v17 = vmul.f32 %v569_v42, %v568_v37 }
  0xac   : > { %1004 = vpow2.f32 %v597_v43  ;;  %v648_v53 = vadd.f32 1e-16, %v647_v47  ;;  %v574_v58 = vsub.f32 0.0, %v573_v52  ;;  %v604_v25 = vadd.f32 %v603_v13, %v566_v15 }
  0xad   : > { %v1418_v54 = vmax.f32 %v670_v51, %v1413_v50  ;;  %1006 = vlog2.f32 %v642_v49  ;;  %v607_v26 = vsub.f32 %v566_v15, %v603_v13  ;;  %v614_v27 = vadd.f32 %v613_v14, %v567_v16  ;;  %v570_v49 = vld [vmem:[%s1351_s16 + $0x28] sm:$0xff] }
  0xae   : > { %1008 = vlog2.f32 %v648_v53  ;;  %v575_v2 = vmul.f32 1.442695, %v574_v58  ;;  %v617_v29 = vsub.f32 %v567_v16, %v613_v14  ;;  %v625_v30 = vand.u32 2147483647, %v624_v17 }
  0xaf   : > { %v674_v55 = vsub.f32 %v1395_v39, %v1418_v54  ;;  %v681_v56 = vsub.f32 %v1399_v41, %v1418_v54  ;;  %v688_v57 = vsub.f32 %v1405_v45, %v1418_v54  ;;  %v695_v61 = vsub.f32 %v1413_v50, %v1418_v54 }
  0xb0   : > { %vm678_vm2 = vcmp.eq.f32.partialorder %v570_v49, 0.0  ;;  %vm685_vm3 = vcmp.eq.f32.partialorder %v570_v49, 1.0  ;;  %vm692_vm5 = vcmp.eq.f32.partialorder %v570_v49, 2.0  ;;  %vm699_vm6 = vcmp.eq.f32.partialorder %v570_v49, 3.0 }
  0xb1   : > { %v675_v59 = vmul.f32 1.442695, %v674_v55  ;;  %v682_v60 = vmul.f32 1.442695, %v681_v56  ;;  %v689_v1 = vmul.f32 1.442695, %v688_v57 }
  0xb2   : > { %v696_v4 = vmul.f32 1.442695, %v695_v61  ;;  %v693_v17 = vsel %vm692_vm5, %v1405_v45, 0.0 }
  0xb3   : > { %1010 = vpow2.f32 %v675_v59 }
  0xb4   : > { %1012 = vpow2.f32 %v682_v60 }
  0xb6   : > { %v999_v62 = vpop.eup %998 }
  0xb7   : > { %v1001_v63 = vpop.eup %1000  ;;  %v584_v0 = vadd.f32 1.0, %v999_v62 }
  0xb8   : > { %v590_v3 = vadd.f32 1.0, %v1001_v63  ;;  %v1003_v5 = vpop.eup %1002  ;;  %v565_v63 = vld [vmem:[%s1351_s16] sm:$0xff] }
  0xb9   : > { %1014 = vrcp.f32 %v584_v0  ;;  %v1005_v7 = vpop.eup %1004  ;;  %v596_v10 = vmul.f32 %v1003_v5, %v595_v6  ;;  %vm571_vm4 = vcmp.eq.f32.partialorder %v565_v63, 1.0 }
  0xba   : > { %1016 = vrcp.f32 %v590_v3  ;;  %v1007_v9 = vpop.eup %1006  ;;  %v600_v11 = vmul.f32 %v1005_v7, %v599_v8  ;;  %v679_v7 = vsel %vm678_vm2, %v1395_v39, 0.0 }
  0xbb   : > { %1018 = vpow2.f32 %v689_v1  ;;  %v1009_v12 = vpop.eup %1008  ;;  %v644_v18 = vmul.f32 0.6931472, %v1007_v9  ;;  %v601_v19 = vmul.f32 0.5, %v596_v10  ;;  %v891_v9 = vld [vmem:[%s1371_s23 + $0x20] sm:$0xff] }
  0xbc   : > { %1020 = vpow2.f32 %v575_v2  ;;  %v622_v20 = vmul.f32 %v600_v11, %v596_v10  ;;  %v611_v22 = vmul.f32 0.5, %v600_v11  ;;  %v650_v23 = vmul.f32 0.6931472, %v1009_v12 }
  0xbd   : > { %1022 = vpow2.f32 %v696_v4  ;;  %v645_v31 = vsub.f32 %v1388_v34, %v644_v18  ;;  %v686_v11 = vsel %vm685_vm3, %v1399_v41, 0.0  ;;  %v700_v18 = vsel %vm699_vm6, %v1413_v50, 0.0 }
  0xbe   : > { %v623_v38 = vand.u32 2147483647, %v622_v20  ;;  %v651_v48 = vsub.f32 %v1391_v36, %v650_v23  ;;  %v896_v23 = vld [vmem:[%s1371_s23 + $0x28] sm:$0xff] }
  0xbf   : > { %v657_v60 = vmul.f32 %v645_v31, %v645_v31  ;;  %v889_v31 = vld [vmem:[%s1371_s23 + $0x10] sm:$0xff] }
  0xc0   : > { %v1011_v21 = vpop.eup %1010  ;;  %v659_v36 = vmul.f32 %v651_v48, %v651_v48  ;;  %v626_v5 = vadd.f32 %v625_v30, %v623_v38 }
  0xc1   : > { %v1013_v24 = vpop.eup %1012 }
  0xc2   : > { %v684_v32 = vadd.f32 %v1013_v24, %v1011_v21 }
  0xc6   : > { %v1015_v28 = vpop.eup %1014 }
  0xc7   : > { %v1017_v33 = vpop.eup %1016  ;;  %v602_v35 = vadd.f32 %v1015_v28, %v601_v19  ;;  %v606_v37 = vsub.f32 %v1015_v28, %v601_v19  ;;  %v638_v40 = vsub.f32 %v1015_v28, %v566_v15  ;;  %v687_v15 = vadd.f32 %v686_v11, %v679_v7 }
  0xc8   : > { %v1019_v42 = vpop.eup %1018  ;;  %v612_v43 = vadd.f32 %v1017_v33, %v611_v22  ;;  %v616_v44 = vsub.f32 %v1017_v33, %v611_v22  ;;  %v639_v47 = vsub.f32 %v1017_v33, %v567_v16 }
  0xc9   : > { %v1021_v51 = vpop.eup %1020  ;;  %v605_v52 = vmin.f32 %v602_v35, %v604_v25  ;;  %v608_v53 = vmax.f32 %v606_v37, %v607_v26  ;;  %v654_v55 = vmul.f32 %v638_v40, %v638_v40  ;;  %v691_v56 = vadd.f32 %v1019_v42, %v684_v32 }
  0xca   : > { %v1023_v34 = vpop.eup %1022  ;;  %v615_v57 = vmin.f32 %v612_v43, %v614_v27  ;;  %v618_v58 = vmax.f32 %v616_v44, %v617_v29  ;;  %v655_v59 = vmul.f32 %v639_v47, %v639_v47  ;;  %v577_v0 = vadd.f32 1.0, %v1021_v51 }
  0xcb   : > { %v609_v61 = vsub.f32 %v605_v52, %v608_v53  ;;  %v698_v62 = vadd.f32 %v1023_v34, %v691_v56  ;;  %v694_v39 = vadd.f32 %v693_v17, %v687_v15  ;;  %v572_v25 = vmax.f32 %v1408_v46, 0.0 }
  0xcc   : > { %v619_v1 = vsub.f32 %v615_v57, %v618_v58  ;;  %v656_v2 = vadd.f32 %v655_v59, %v654_v55 }
  0xcd   : > { %v610_v3 = vmax.f32 %v609_v61, 0.0  ;;  %1024 = vlog2.f32 %v698_v62  ;;  %v701_v41 = vadd.f32 %v700_v18, %v694_v39 }
  0xce   : > { %v620_v4 = vmax.f32 %v619_v1, 0.0  ;;  %v658_v6 = vadd.f32 %v657_v60, %v656_v2  ;;  %1026 = vlog2.f32 %v577_v0 }
  0xd0   : > { %v621_v8 = vmul.f32 %v620_v4, %v610_v3  ;;  %v660_v10 = vadd.f32 %v659_v36, %v658_v6 }
  0xd2   : > { %v627_v12 = vsub.f32 %v626_v5, %v621_v8  ;;  %v661_v13 = vsel %vm571_vm4, %v660_v10, 0.0 }
  0xd3   : > { %v662_v14 = vadd.f32 %v891_v9, %v661_v13 }
  0xd4   : > { %v628_v16 = vadd.f32 1e-06, %v627_v12 }
  0xd5   : > { %892 = vst [vmem:[%s1371_s23 + $0x20] sm:$0xff] %v662_v14 }
  0xd6   : > { %1028 = vrcp.f32 %v628_v16 }
  0xda   : > { %v1025_v19 = vpop.eup %1024 }
  0xdb   : > { %v703_v20 = vmul.f32 0.6931472, %v1025_v19  ;;  %v1027_v21 = vpop.eup %1026 }
  0xdc   : > { %v579_v45 = vmul.f32 0.6931472, %v1027_v21 }
  0xdd   : > { %v704_v22 = vadd.f32 %v703_v20, %v1418_v54 }
  0xde   : > { %v580_v29 = vadd.f32 %v579_v45, %v572_v25 }
  0xdf   : > { %v707_v24 = vsub.f32 %v704_v22, %v701_v41 }
  0xe1   : > { %v708_v26 = vsel %vm571_vm4, %v707_v24, 0.0 }
  0xe2   : > { %v709_v27 = vadd.f32 %v896_v23, %v708_v26 }
  0xe3   : > { %v1029_v28 = vpop.eup %1028 }
  0xe4   : > { %v630_v30 = vmul.f32 %v1029_v28, %v621_v8  ;;  %897 = vst [vmem:[%s1371_s23 + $0x28] sm:$0xff] %v709_v27 }
  0xe6   : > { %v633_v50 = vmul.f32 %v630_v30, %v1408_v46 }
  0xe8   : > { %v634_v32 = vsub.f32 %v580_v29, %v633_v50 }
  0xea   : > { %v635_v33 = vsel %vm571_vm4, %v634_v32, 0.0 }
  0xeb   : > { %v636_v54 = vadd.f32 %v889_v31, %v635_v33 }
  0xed   : > { %890 = vst [vmem:[%s1371_s23 + $0x10] sm:$0xff] %v636_v54 }
  0xee PF: > { %s27_s13 = sadd.s32 1, %s1145_s13   ;;  %s1504_s3 = sld [smem:[#allocation12_spill]] }
  0xef   : > { %p24_p9 = scmp.ge.s32.totalorder %s27_s13, 8   ;;  %s1505_s26 = sld [smem:[#allocation13_spill]] }
  0xf0   : > { %s1506_s1 = smov %s1117_s30  ;;  %s1507_s30 = smov %s1308_s15 }
  0xf1   : > { %s1508_s7 = smov %s1125_s8  ;;  %s1509_s8 = smov %s1271_s0 }
  0xf2   : > { %s1510_s9 = smov %s1137_s11  ;;  %s1511_s10 = smov %s1141_s12 }
  0xf3   :  { %26 = sbr.rel (!%p24_p9) target bundleno = 32 (0x20), region = 222 }
  0xf4   : > { %s1512_s11 = smov %s1504_s3 }
  0xf5   : > { %s1513_s12 = smov %s1505_s26 }
  0xf8   :  { %740 = vsyncpa [#allocation6], 1 }
  0xf9   :  { %742 = vsyncpa [#allocation6 + $0x1], 1 }

</bundles_post_ra>
